<compile_context>
chip_gen: v6e
topology: v6e:2x2x1
jax: 0.10.0
libtpu: 0.0.40
codegen_flags: <defaults>
</compile_context>

<pallas_src>
import functools

import jax
import jax.numpy as jnp
from jax import lax
from jax.experimental import pallas as pl
from jax.experimental.pallas import tpu as pltpu


_TARGET_BLOCK_BYTES = 2 * 1024 * 1024   # per-block input bytes (1-4 MiB sweet spot)
_MIN_GRID_BLOCKS = 8                    # pipeline depth + megacore sharding (>= 2 TCs)
_FUSE_MAX_BYTES = 8 * 1024 * 1024       # fuse same-H*W stages only while the extra
                                        # concat copy is cheaper than saved launches


def _round_up(x, m):
    return ((x + m - 1) // m) * m


def _sublane_req(dtype):
    # Minimum sublane multiple: f32 -> 8, bf16 -> 16, int8/fp8 -> 32.
    return {4: 8, 2: 16, 1: 32}.get(jnp.dtype(dtype).itemsize, 8)


def _physical_vmem_bytes():
    cap = 64 * 1024 * 1024  # conservative default == v7x per-TC physical VMEM
    try:
        info = pltpu.get_tpu_info()
        cap = int(getattr(info, "vmem_capacity_bytes", cap))
    except Exception:
        pass
    return cap


def _choose_row_tile(R, HW, t_dtype, s_dtype):
    """Pick (row-tile, n_blocks) for an (R, HW) teacher/student pair."""
    # Sublane alignment must satisfy BOTH input dtypes (mixed f32/bf16 groups).
    sub = max(_sublane_req(t_dtype), _sublane_req(s_dtype))
    bytes_per_row = HW * (jnp.dtype(t_dtype).itemsize + jnp.dtype(s_dtype).itemsize)
    # ~1-4 MiB of input per block is already at the HBM roofline; bigger tiles
    # only collapse the grid (no pipelining) and raise vreg/spill pressure.
    tr_bytes = max(sub, (_TARGET_BLOCK_BYTES // max(bytes_per_row, 1)) // sub * sub)
    # Keep >= _MIN_GRID_BLOCKS grid steps when R allows: DMA/compute overlap
    # plus work for both TensorCores on v7x.
    tr_depth = max(sub, _round_up(-(-R // _MIN_GRID_BLOCKS), sub))
    tr = min(tr_bytes, tr_depth, _round_up(R, sub))
    n_blocks = -(-R // tr)
    return tr, n_blocks


def _vmem_limit_bytes(tr, HW, t_dtype, s_dtype):
    in_block = tr * HW * (jnp.dtype(t_dtype).itemsize + jnp.dtype(s_dtype).itemsize)
    f32_tile = tr * HW * 4
    # Double-buffered inputs + ~6 live f32 intermediate tiles + slack.
    est = 2 * in_block + 6 * f32_tile + (2 << 20)
    cap = _physical_vmem_bytes()
    return int(min(max(est, 32 * 1024 * 1024), (cap * 3) // 4))


def _cwd_group_kernel(t_ref, s_ref, w_ref, o_ref, *, tau, rows_valid, block_rows):
    """One (block_rows, HW) row tile -> one lane-dense (1, 8, 128) partial tile.

    Per valid row r:
      kl_r = sum_cols softmax(t_r/tau) * (logsoftmax(t_r/tau) - logsoftmax(s_r/tau))
    The block stores sum_r w_r * kl_r (broadcast over the tile).  Rows at or
    beyond `rows_valid` (ragged last block) hold unspecified data and are
    masked to zero — all math before the mask is strictly row-local.
    """
    t = t_ref[...].astype(jnp.float32)
    s = s_ref[...].astype(jnp.float32)
    if tau != 1.0:  # compile-time constant: skip 2 VPU multiplies/elem when tau == 1
        inv_tau = jnp.float32(1.0 / tau)
        t = t * inv_tau
        s = s * inv_tau

    # Teacher: stable shifted exp + normalizer.
    t_max = jnp.max(t, axis=-1, keepdims=True)
    t_sh = t - t_max
    exp_t = jnp.exp(t_sh)
    sum_t = jnp.sum(exp_t, axis=-1, keepdims=True)

    # Student: only the normalizer is needed.
    s_max = jnp.max(s, axis=-1, keepdims=True)
    s_sh = s - s_max
    sum_s = jnp.sum(jnp.exp(s_sh), axis=-1, keepdims=True)

    # logsoftmax(t) - logsoftmax(s) == (t_sh - s_sh) + (log(sum_s) - log(sum_t))
    diff = (t_sh - s_sh) + (jnp.log(sum_s) - jnp.log(sum_t))

    # Row KL = sum_cols(exp_t * diff) / sum_t  (never materializes softmax_t).
    row_kl = jnp.sum(exp_t * diff, axis=-1, keepdims=True) * pl.reciprocal(
        sum_t, approx=False)

    # Fold the per-row stage weight tau^2/(C*N) and mask rows past the end of
    # the (possibly ragged) row range.
    row_ids = lax.broadcasted_iota(jnp.int32, row_kl.shape, 0) + (
        pl.program_id(0) * block_rows)
    row_kl = jnp.where(row_ids < rows_valid, row_kl * w_ref[...], 0.0)

    blk = jnp.sum(row_kl, axis=0, keepdims=True)       # (1, 1) cross-sublane reduce
    o_ref[...] = jnp.broadcast_to(blk, o_ref.shape)    # unmasked lane-dense store


def _cwd_group_cost(t2d, s2d, row_w, tau):
    """Weighted sum over rows of KL(softmax(t_row/tau) || softmax(s_row/tau))."""
    R, HW = t2d.shape
    tr, n_blocks = _choose_row_tile(R, HW, t2d.dtype, s2d.dtype)
    # TODO(synk): segmentation-scale H*W (>~128K) needs a lane-axis (HW) grid
    # dimension with a two-pass / online softmax; a single (tr, HW) tile plus
    # f32 intermediates can exceed v7x's 64 MiB VMEM.
    vmem_limit = _vmem_limit_bytes(tr, HW, t2d.dtype, s2d.dtype)

    out = pl.pallas_call(
        functools.partial(_cwd_group_kernel, tau=float(tau), rows_valid=R,
                          block_rows=tr),
        out_shape=jax.ShapeDtypeStruct((n_blocks, 8, 128), jnp.float32),
        grid_spec=pltpu.PrefetchScalarGridSpec(
            num_scalar_prefetch=0,
            grid=(n_blocks,),
            in_specs=[
                pl.BlockSpec((tr, HW), lambda i: (i, 0)),
                pl.BlockSpec((tr, HW), lambda i: (i, 0)),
                pl.BlockSpec((tr, 1), lambda i: (i, 0)),
            ],
            out_specs=pl.BlockSpec((1, 8, 128), lambda i: (i, 0, 0)),
        ),
        compiler_params=pltpu.CompilerParams(
            # Per-block partials -> no cross-step dependency -> megacore-shardable.
            dimension_semantics=("parallel",),
            vmem_limit_bytes=vmem_limit,
        ),
    )(t2d, s2d, row_w)
    # Tiny final reduction: one scalar per block.
    return jnp.sum(out[:, 0, 0])


def cwd_loss(y_s, y_t, tau=1.0):
    """Channel-wise distillation loss over a list of stages.

    Args:
        y_s: list of student feature maps, each (N, C, H, W).
        y_t: list of teacher feature maps, each (N, C, H, W).
        tau: temperature.
    Returns:
        scalar float32 loss (sum over stages).
    """
    assert len(y_s) == len(y_t)
    # Group stages that share H*W; small groups are fused into a single
    # pallas_call with the per-stage factor tau^2/(C*N) folded into a per-row
    # weight, so launch / pipeline warm-up is paid once per group.
    groups = {}
    for s, t in zip(y_s, y_t):
        assert s.shape == t.shape
        N, C, H, W = s.shape
        hw = H * W
        w = float(tau) ** 2 / float(C * N)
        groups.setdefault(hw, []).append((t.reshape(N * C, hw), s.reshape(N * C, hw), w))

    total = jnp.float32(0.0)
    for hw, items in groups.items():
        group_bytes = sum(it[0].size * jnp.dtype(it[0].dtype).itemsize
                          + it[1].size * jnp.dtype(it[1].dtype).itemsize
                          for it in items)
        if len(items) > 1 and group_bytes <= _FUSE_MAX_BYTES:
            # Fuse small same-H*W stages: the concat copy is cheaper here than
            # per-stage launch/warm-up.  Mixed dtypes are promoted (exact for
            # bf16 -> f32).
            t_dt = jnp.result_type(*[it[0].dtype for it in items])
            s_dt = jnp.result_type(*[it[1].dtype for it in items])
            calls = [(
                jnp.concatenate([it[0].astype(t_dt) for it in items], axis=0),
                jnp.concatenate([it[1].astype(s_dt) for it in items], axis=0),
                jnp.concatenate(
                    [jnp.full((it[0].shape[0], 1), it[2], dtype=jnp.float32)
                     for it in items], axis=0),
            )]
        else:
            # Large (or lone) stages: stream each tensor exactly once.
            calls = [(it[0], it[1],
                      jnp.full((it[0].shape[0], 1), it[2], dtype=jnp.float32))
                     for it in items]
        for t2d, s2d, row_w in calls:
            total = total + _cwd_group_cost(t2d, s2d, row_w, tau)
    return total


def _reference_cwd_loss(y_s, y_t, tau=1.0):
    """Plain-JAX reference mirroring the PyTorch semantics."""
    total = 0.0
    for s, t in zip(y_s, y_t):
        N, C, H, W = s.shape
        s2d = s.reshape(-1, H * W).astype(jnp.float32) / tau
        t2d = t.reshape(-1, H * W).astype(jnp.float32) / tau
        softmax_t = jax.nn.softmax(t2d, axis=1)
        cost = jnp.sum(
            softmax_t * jax.nn.log_softmax(t2d, axis=1)
            - softmax_t * jax.nn.log_softmax(s2d, axis=1)
        ) * (tau ** 2)
        total = total + cost / (C * N)
    return total


if __name__ == "__main__":
    key = jax.random.PRNGKey(0)
    # Stages exercise: a fused same-H*W group with mixed dtypes and a ragged
    # row count (16 + 3 = 19), a multi-block fused group (8 + 128 = 136 rows),
    # and a lone stage with H*W below one full lane row (64).
    stage_cfg = [
        ((2, 4, 16, 16), jnp.float32),    # HW=256
        ((2, 8, 8, 16), jnp.float32),     # HW=128
        ((1, 3, 8, 16), jnp.bfloat16),    # HW=128 -> fused with previous (19 rows, ragged)
        ((2, 64, 16, 16), jnp.float32),   # HW=256 -> fused with stage 0 (136 rows, multi-block)
        ((2, 4, 8, 8), jnp.float32),      # HW=64  -> single-stage group, HW < 128 lanes
    ]
    y_s, y_t = [], []
    for shp, dt in stage_cfg:
        key, k1, k2 = jax.random.split(key, 3)
        y_s.append(jax.random.normal(k1, shp, dtype=jnp.float32).astype(dt))
        y_t.append(jax.random.normal(k2, shp, dtype=jnp.float32).astype(dt))

    for tau in (1.0, 2.0):
        loss = jax.block_until_ready(cwd_loss(y_s, y_t, tau=tau))
        ref = jax.block_until_ready(_reference_cwd_loss(y_s, y_t, tau=tau))
        assert jnp.allclose(loss, ref, rtol=1e-5, atol=1e-5), (tau, loss, ref)

    print("KERNEL_OK")
</pallas_src>

<mosaic_0001>
module attributes {stable_mosaic.version = 11 : i64} {
  func.func @_cwd_group_kernel(%arg0: i32, %arg1: memref<24x256xf32, #tpu.memory_space<vmem>>, %arg2: memref<24x256xf32, #tpu.memory_space<vmem>>, %arg3: memref<24x1xf32, #tpu.memory_space<vmem>>, %arg4: memref<1x8x128xf32, #tpu.memory_space<vmem>>) attributes {dimension_semantics = [#tpu.dimension_semantics<parallel>], iteration_bounds = array<i64: 6>, scalar_prefetch = 0 : i64, scratch_operands = 0 : i64, tpu.core_type = #tpu.core_type<tc>, window_params = [{transform_indices = @transform_0, window_bounds = array<i64: 24, 256>}, {transform_indices = @transform_1, window_bounds = array<i64: 24, 256>}, {transform_indices = @transform_2, window_bounds = array<i64: 24, 1>}, {transform_indices = @transform_3, window_bounds = array<i64: 1, 8, 128>}]} {
    %c0 = arith.constant 0 : index
    %c0_0 = arith.constant 0 : index
    %0 = vector.load %arg1[%c0, %c0_0] : memref<24x256xf32, #tpu.memory_space<vmem>>, vector<24x256xf32>
    %c0_1 = arith.constant 0 : index
    %c0_2 = arith.constant 0 : index
    %1 = vector.load %arg2[%c0_1, %c0_2] : memref<24x256xf32, #tpu.memory_space<vmem>>, vector<24x256xf32>
    %cst = arith.constant dense<0xFF800000> : vector<24xf32>
    %2 = vector.multi_reduction <maximumf>, %0, %cst [1] : vector<24x256xf32> to vector<24xf32>
    %3 = vector.shape_cast %2 : vector<24xf32> to vector<24x1xf32>
    %4 = vector.broadcast %3 : vector<24x1xf32> to vector<24x256xf32>
    %5 = arith.subf %0, %4 : vector<24x256xf32>
    %6 = math.exp %5 : vector<24x256xf32>
    %cst_3 = arith.constant dense<0.000000e+00> : vector<24xf32>
    %7 = vector.multi_reduction <add>, %6, %cst_3 [1] : vector<24x256xf32> to vector<24xf32>
    %8 = vector.shape_cast %7 : vector<24xf32> to vector<24x1xf32>
    %cst_4 = arith.constant dense<0xFF800000> : vector<24xf32>
    %9 = vector.multi_reduction <maximumf>, %1, %cst_4 [1] : vector<24x256xf32> to vector<24xf32>
    %10 = vector.shape_cast %9 : vector<24xf32> to vector<24x1xf32>
    %11 = vector.broadcast %10 : vector<24x1xf32> to vector<24x256xf32>
    %12 = arith.subf %1, %11 : vector<24x256xf32>
    %13 = math.exp %12 : vector<24x256xf32>
    %cst_5 = arith.constant dense<0.000000e+00> : vector<24xf32>
    %14 = vector.multi_reduction <add>, %13, %cst_5 [1] : vector<24x256xf32> to vector<24xf32>
    %15 = vector.shape_cast %14 : vector<24xf32> to vector<24x1xf32>
    %16 = arith.subf %5, %12 : vector<24x256xf32>
    %17 = math.log %15 : vector<24x1xf32>
    %18 = math.log %8 : vector<24x1xf32>
    %19 = arith.subf %17, %18 : vector<24x1xf32>
    %20 = vector.broadcast %19 : vector<24x1xf32> to vector<24x256xf32>
    %21 = arith.addf %16, %20 : vector<24x256xf32>
    %22 = arith.mulf %6, %21 : vector<24x256xf32>
    %cst_6 = arith.constant dense<0.000000e+00> : vector<24xf32>
    %23 = vector.multi_reduction <add>, %22, %cst_6 [1] : vector<24x256xf32> to vector<24xf32>
    %24 = vector.shape_cast %23 : vector<24xf32> to vector<24x1xf32>
    %25 = tpu.reciprocal %8 : vector<24x1xf32> -> vector<24x1xf32>
    %26 = arith.mulf %24, %25 : vector<24x1xf32>
    %27 = tpu.iota {dimensions = array<i32: 0>} : vector<24x1xi32>
    %c24_i32 = arith.constant 24 : i32
    %28 = arith.muli %arg0, %c24_i32 : i32
    %29 = vector.broadcast %28 : i32 to vector<24x1xi32>
    %30 = arith.addi %27, %29 : vector<24x1xi32>
    %c136_i32 = arith.constant 136 : i32
    %31 = vector.broadcast %c136_i32 : i32 to vector<24x1xi32>
    %32 = arith.cmpi slt, %30, %31 : vector<24x1xi32>
    %c0_7 = arith.constant 0 : index
    %c0_8 = arith.constant 0 : index
    %33 = vector.load %arg3[%c0_7, %c0_8] : memref<24x1xf32, #tpu.memory_space<vmem>>, vector<24x1xf32>
    %34 = arith.mulf %26, %33 : vector<24x1xf32>
    %cst_9 = arith.constant 0.000000e+00 : f32
    %35 = vector.broadcast %cst_9 : f32 to vector<24x1xf32>
    %36 = arith.select %32, %34, %35 : vector<24x1xi1>, vector<24x1xf32>
    %cst_10 = arith.constant dense<0.000000e+00> : vector<1xf32>
    %37 = vector.multi_reduction <add>, %36, %cst_10 [0] : vector<24x1xf32> to vector<1xf32>
    %38 = vector.shape_cast %37 : vector<1xf32> to vector<1x1xf32>
    %39 = vector.shape_cast %38 : vector<1x1xf32> to vector<1x1x1xf32>
    %40 = vector.broadcast %39 : vector<1x1x1xf32> to vector<1x8x128xf32>
    %c0_11 = arith.constant 0 : index
    %c0_12 = arith.constant 0 : index
    %c0_13 = arith.constant 0 : index
    %41 = vector.load %arg4[%c0_11, %c0_12, %c0_13] : memref<1x8x128xf32, #tpu.memory_space<vmem>>, vector<1x8x128xf32>
    tpu.vector_store %arg4[%c0_11, %c0_12, %c0_13], %40 {strides = array<i32>} : memref<1x8x128xf32, #tpu.memory_space<vmem>>, vector<1x8x128xf32>,
    return
  }
  func.func @transform_0(%arg0: i32) -> (i32, i32) {
    %c0_i32 = arith.constant 0 : i32
    %c0_i32_0 = arith.constant 0 : i32
    return %arg0, %c0_i32 : i32, i32
  }
  func.func @transform_1(%arg0: i32) -> (i32, i32) {
    %c0_i32 = arith.constant 0 : i32
    %c0_i32_0 = arith.constant 0 : i32
    return %arg0, %c0_i32 : i32, i32
  }
  func.func @transform_2(%arg0: i32) -> (i32, i32) {
    %c0_i32 = arith.constant 0 : i32
    %c0_i32_0 = arith.constant 0 : i32
    return %arg0, %c0_i32 : i32, i32
  }
  func.func @transform_3(%arg0: i32) -> (i32, i32, i32) {
    %c0_i32 = arith.constant 0 : i32
    %c0_i32_0 = arith.constant 0 : i32
    %c0_i32_1 = arith.constant 0 : i32
    return %arg0, %c0_i32, %c0_i32_0 : i32, i32, i32
  }
}

</mosaic_0001>

<bundles_post_ra>
// kernel: tpu_custom_call.1
= control target key start
LH: loop header
LB: loop body
LE: loop exit
PB: predicated region body
PF: predicated region fallthrough
CT: control target
= control target key end

     0   :  { %8 = vsyncpa [#allocation3], 0  ;;  %s1135_s0 = inlined_call_operand.hbm [shape: f32[136,256], index: 0, kind: input, shape index: {}]   ;;  %s1136_s1 = inlined_call_operand.hbm [shape: f32[136,256], index: 1, kind: input, shape index: {}]   ;;  %s1137_s2 = inlined_call_operand.vmem [shape: f32[136,1], index: 2, kind: input, shape index: {}]   ;;  %s1138_s3 = inlined_call_operand.hbm [shape: f32[6,8,128], index: 3, kind: output, shape index: {}]  }
   0x1   :  { %10 = vsyncpa [#allocation3 + $0x1], 0 }
   0x2   :  { %11 = vsyncpa [#allocation6], 0 }
   0x3   :  { %13 = vsyncpa [#allocation6 + $0x1], 0 }
   0x4   :  { %14 = vsyncpa [#allocation4], 0 }
   0x5   :  { %16 = vsyncpa [#allocation4 + $0x1], 0  ;;  %s864_s12 = smov 0   ;;  %s866_s13 = smov 0  }
   0x6   :  { %s868_s14 = smov 0   ;;  %s870_s15 = smov 0  }
   0x7 LB: > { %s885_s16 = sadd.s32 4294967295, %s834_s15   ;;  %s589_s17 = sadd.s32 4294967294, %s834_s15   ;;  %s834_s15 = sphi %s870_s15, %s1149_s15   ;;  %s830_s14 = sphi %s868_s14, %s1148_s14   ;;  %s826_s13 = sphi %s866_s13, %s1147_s13   ;;  %s822_s12 = sphi %s864_s12, %s1146_s12  }
   0x8   : > { %s889_s18 = sadd.s32 1, %s834_s15   ;;  %s29_s19 = sadd.s32 1, %s830_s14 }
   0x9   : > { %s26_s20 = ssub.s32 %s834_s15, %s889_s18  ;;  %p36_p0 = scmp.ne.s32.totalorder %s830_s14, %s826_s13 }
   0xa   : > { %p27_p1 = scmp.eq.s32.totalorder %s26_s20, 0  ;;  %p37_p2 = scmp.eq.s32.totalorder %s834_s15, 0 }
   0xb   : > { %p42_p3 = scmp.ne.s32.totalorder %s826_s13, %s822_s12  ;;  %p43_p4 = scmp.eq.s32.totalorder %s885_s16, 0 }
   0xc   : > { %s901_s21 = scalar_select %p27_p1, %s830_s14, %s29_s19  }
   0xd   : > { %p903_p5 = por %p37_p2, %p36_p0  ;;  %p907_p6 = por %p43_p4, %p42_p3 }
   0xe   : > { %p118_p7 = scmp.eq.s32.totalorder %s885_s16, 5  ;;  %p124_p8 = scmp.eq.s32.totalorder %s589_s17, 5 }
   0xf   : > { %p591_p11 = scmp.ge.s32.totalorder %s834_s15, 6 }
  0x10   : > { %p912_p9 = por %p118_p7, %p36_p0  ;;  %p916_p10 = por %p124_p8, %p42_p3 }
  0x11   : > { %140 = sbr.rel (%p591_p11) target bundleno = 90 (0x5a), region = 16 }
  0x12   : > { %s1142_s24 = scalar_select %p912_p9, 1, 0 }
  0x13   : > { %s1143_s25 = scalar_select %p916_p10, 1, 0 }
  0x16   : > { %143 = sbr.rel (!%p903_p5) target bundleno = 56 (0x38), region = 20  ;;  %s144_s26 = sand.u32 (%p903_p5), 1, %s830_s14  }
  0x17   : > { %s149_s27 = smul.u32 (%p903_p5), 3, %s834_s15  ;;  %s928_s5 = scalar_lea.sflag (%p903_p5), [#allocation3], %s144_s26 }
  0x18   : > { %s621_s28 = smul.u32 (%p903_p5), 48, %s144_s26 }
  0x19   : > { %s150_s29 = ssub.s32 (%p903_p5), 17, %s149_s27 }
  0x1a   : > { %p151_p12 = scmp.lt.s32.totalorder (%p903_p5), %s150_s29, 3  ;;  %s148_s6 = scalar_lea.vmem (%p903_p5), [#allocation2], %s621_s28 }
  0x1c   : > { %s1151_s29 = smov (!%p151_p12, %s150_s29), 3 }
  0x1d   : > { %s925_s30 = sshll.u32 %s1151_s29, 8 }
  0x1e   : > { %s156_s4 = ssub.s32 768, %s925_s30 }
  0x1f   : > { %157 = vsyncadd %s928_s5, %s156_s4  ;;  %p594_p13 = scmp.ne.s32.totalorder %s925_s30, 0  ;;  %s619_s7 = smul.u32 768, %s834_s15 }
  0x20   : > { %s163_s8 = sshll.u32 %s148_s6, 4  ;;  %s718_s26 = scalar_lea.hbm %s1135_s0, 4352  ;;  %s938_s8 = int_to_ptr.vmem [resolvable:$true] %s163_s8 }
  0x21   : > { %s936_s11 = scalar_lea.hbm %s1135_s0, %s619_s7 }
  0x22   : > { %s714_s17 = scalar_lea.hbm %s936_s11, %s925_s30  ;;  %p719_p3 = scmp.lt.s32.totalorder %s936_s11, %s1135_s0 }
  0x23   : > { %p715_p0 = scmp.ne.s32.totalorder %s936_s11, %s714_s17  ;;  %p720_p4 = scmp.lt.s32.totalorder %s718_s26, %s714_s17 }
  0x25   : > { %p716_p1 = pnand %p715_p0, %p594_p13  ;;  %p721_p7 = por %p720_p4, %p719_p3 }
  0x27   : > { %p717_p2 = pneg %p716_p1 }
  0x29   : > { %p722_p8 = pnand %p721_p7, %p717_p2 }
  0x2b   : > { %725 = shalt.err (!%p722_p8)
}
  0x2c   : > { %s726_s29 = scalar_lea.vmem %s938_s8, %s925_s30  ;;  %s836_s4 = smov [#allocation2]  }
  0x2d   : > { %p727_p11 = scmp.ne.s32.totalorder %s938_s8, %s726_s29  ;;  %s730_s6 = sshll.u32 %s836_s4, 4  ;;  %s731_s6 = int_to_ptr.vmem [resolvable:$false] %s730_s6 }
  0x2e   : > { %s732_s7 = scalar_lea.vmem %s731_s6, 1536  ;;  %p733_p1 = scmp.lt.s32.totalorder %s938_s8, %s731_s6 }
  0x2f   : > { %p728_p12 = pnand %p727_p11, %p594_p13  ;;  %p734_p10 = scmp.lt.s32.totalorder %s732_s7, %s726_s29 }
  0x31   : > { %p729_p0 = pneg %p728_p12  ;;  %p735_p9 = por %p734_p10, %p733_p1 }
  0x33   : > { %p736_p3 = pnand %p735_p9, %p729_p0 }
  0x35   : > { %739 = shalt.err (!%p736_p3)
}
  0x36   : > { %s837_s9 = smov 256   ;;  %s838_s10 = smov 16  }
  0x37   : > { %169 = dma.hbm_to_vmem [thread:$0]  (%p594_p13), %s936_s11, %s925_s30, %s938_s8, %s928_s5, %s837_s9, %s837_s9, %s838_s10  }
  0x38 PF: > { %172 = sbr.rel (!%p903_p5) target bundleno = 90 (0x5a), region = 24  ;;  %s173_s17 = sand.u32 (%p903_p5), 1, %s830_s14  }
  0x39   : > { %s178_s19 = smul.u32 (%p903_p5), 3, %s834_s15  ;;  %s971_s29 = scalar_lea.sflag (%p903_p5), [#allocation6], %s173_s17 }
  0x3a   : > { %s622_s20 = smul.u32 (%p903_p5), 48, %s173_s17 }
  0x3b   : > { %s179_s26 = ssub.s32 (%p903_p5), 17, %s178_s19 }
  0x3c   : > { %p180_p9 = scmp.lt.s32.totalorder (%p903_p5), %s179_s26, 3  ;;  %s177_s30 = scalar_lea.vmem (%p903_p5), [#allocation5], %s622_s20 }
  0x3e   : > { %s1153_s26 = smov (!%p180_p9, %s179_s26), 3 }
  0x3f   : > { %s968_s27 = sshll.u32 %s1153_s26, 8 }
  0x40   : > { %s185_s28 = ssub.s32 768, %s968_s27 }
  0x41   : > { %186 = vsyncadd %s971_s29, %s185_s28  ;;  %p601_p5 = scmp.ne.s32.totalorder %s968_s27, 0  ;;  %s620_s22 = smul.u32 768, %s834_s15 }
  0x42   : > { %s192_s5 = sshll.u32 %s177_s30, 4  ;;  %s744_s10 = scalar_lea.hbm %s1136_s1, 4352  ;;  %s981_s5 = int_to_ptr.vmem [resolvable:$true] %s192_s5 }
  0x43   : > { %s979_s4 = scalar_lea.hbm %s1136_s1, %s620_s22 }
  0x44   : > { %s740_s6 = scalar_lea.hbm %s979_s4, %s968_s27  ;;  %p745_p4 = scmp.lt.s32.totalorder %s979_s4, %s1136_s1 }
  0x45   : > { %p741_p10 = scmp.ne.s32.totalorder %s979_s4, %s740_s6  ;;  %p746_p7 = scmp.lt.s32.totalorder %s744_s10, %s740_s6 }
  0x47   : > { %p742_p13 = pnand %p741_p10, %p601_p5  ;;  %p747_p8 = por %p746_p7, %p745_p4 }
  0x49   : > { %p743_p2 = pneg %p742_p13 }
  0x4b   : > { %p748_p11 = pnand %p747_p8, %p743_p2 }
  0x4d   : > { %751 = shalt.err (!%p748_p11)
}
  0x4e   : > { %s752_s20 = scalar_lea.vmem %s981_s5, %s968_s27  ;;  %s839_s26 = smov [#allocation5]  }
  0x4f   : > { %p753_p12 = scmp.ne.s32.totalorder %s981_s5, %s752_s20  ;;  %s756_s28 = sshll.u32 %s839_s26, 4  ;;  %s757_s28 = int_to_ptr.vmem [resolvable:$false] %s756_s28 }
  0x50   : > { %s758_s30 = scalar_lea.vmem %s757_s28, 1536  ;;  %p759_p3 = scmp.lt.s32.totalorder %s981_s5, %s757_s28 }
  0x51   : > { %p754_p0 = pnand %p753_p12, %p601_p5  ;;  %p760_p9 = scmp.lt.s32.totalorder %s758_s30, %s752_s20 }
  0x53   : > { %p755_p1 = pneg %p754_p0  ;;  %p761_p10 = por %p760_p9, %p759_p3 }
  0x55   : > { %p762_p13 = pnand %p761_p10, %p755_p1 }
  0x57   : > { %765 = shalt.err (!%p762_p13)
}
  0x58   : > { %s840_s22 = smov 256   ;;  %s841_s8 = smov 16  }
  0x59   : > { %198 = dma.hbm_to_vmem [thread:$0]  (%p601_p5), %s979_s4, %s968_s27, %s981_s5, %s971_s29, %s840_s22, %s840_s22, %s841_s8  }
  0x5a PF: > { %p606_p2 = scmp.ge.s32.totalorder %s834_s15, 1  ;;  %p217_p4 = scmp.lt.s32.totalorder %s834_s15, 7 }
  0x5c   : > { %p218_p7 = pnand %p606_p2, %p217_p4 }
  0x5d   : > { %s1010_s11 = sand.u32 (!%p218_p7), 1, %s826_s13  }
  0x5e   : > { %221 = sbr.rel (%p218_p7) target bundleno = 735 (0x2df), region = 32  ;;  %s224_s7 = scalar_lea.sflag (!%p218_p7), [#allocation3], %s1010_s11 }
  0x5f   : > { %s623_s6 = smul.u32 (!%p218_p7), 48, %s1010_s11 }
  0x61   : > { %s227_s9 = scalar_lea.vmem (!%p218_p7), [#allocation2], %s623_s6 }
  0x63   : > { %809 = dma.done.wait (%p907_p6), %s224_s7, 768  }
  0x64   : > { %811 = vsyncadd (%p907_p6), %s224_s7, 4294966528  ;;  %s233_s27 = scalar_lea.sflag [#allocation6], %s1010_s11  ;;  %s236_s29 = scalar_lea.vmem [#allocation5], %s623_s6 }
  0x65   : > { %813 = dma.done.wait (%p907_p6), %s233_s27, 768  }
  0x66   : > { %815 = vsyncadd (%p907_p6), %s233_s27, 4294966528  ;;  %v305_v0 = vld [vmem:[%s236_s29] sm:$0xff]  ;;  %v306_v1 = vld [vmem:[%s236_s29 + $0x8] sm:$0xff]  ;;  %s285_s23 = smul.u32 3, %s885_s16  ;;  %vm452_vm2 = vcmask 7168   ;;  %s607_s20 = sshll.u32 %s1010_s11, 3 }
  0x67   : > { %v299_v2 = vld [vmem:[%s227_s9] sm:$0xff]  ;;  %v347_v3 = vmax.f32 %v305_v0, %v306_v1  ;;  %v300_v4 = vld [vmem:[%s227_s9 + $0x8] sm:$0xff]  ;;  %v307_v5 = vld [vmem:[%s236_s29 + $0x10] sm:$0xff]  ;;  %s435_s5 = smul.u32 24, %s885_s16  ;;  %s272_s26 = scalar_lea.vmem [#allocation7], %s607_s20 }
  0x68   : > { %v308_v6 = vld [vmem:[%s236_s29 + $0x18] sm:$0xff]  ;;  %v311_v7 = vmax.f32 %v299_v2, %v300_v4  ;;  %v301_v8 = vld [vmem:[%s227_s9 + $0x10] sm:$0xff]  ;;  %v309_v12 = vld [vmem:[%s236_s29 + $0x20] sm:$0xff]  ;;  %p290_p6 = scmp.lt.s32.totalorder %s285_s23, 16  ;;  %s484_s28 = sshll.u32 %s272_s26, 4  ;;  %s1096_s28 = int_to_ptr.vmem [resolvable:$true] %s484_s28 }
  0x69   : > { %v302_v9 = vld [vmem:[%s227_s9 + $0x18] sm:$0xff]  ;;  %348 = vmax.xlane.f32.xlu1 %v347_v3  ;;  %v350_v10 = vmax.f32 %v307_v5, %v308_v6  ;;  %v310_v13 = vld [vmem:[%s236_s29 + $0x28] sm:$0xff]  ;;  %v303_v14 = vld [vmem:[%s227_s9 + $0x20] sm:$0xff]  ;;  %s610_s30 = sshll.u32 %s885_s16, 7  ;;  %s471_s7 = scalar_lea.sflag [#allocation4], %s1010_s11 }
  0x6a   : > { %312 = vmax.xlane.f32.xlu0 %v311_v7  ;;  %v314_v11 = vmax.f32 %v301_v8, %v302_v9  ;;  %v304_v15 = vld [vmem:[%s227_s9 + $0x28] sm:$0xff]  ;;  %v353_v16 = vmax.f32 %v309_v12, %v310_v13  ;;  %s1155_s23 = smov (!%p290_p6, %s285_s23), 16  ;;  %s482_s6 = scalar_lea.hbm %s1138_s3, %s610_s30 }
  0x6b   : > { %v317_v17 = vmax.f32 %v303_v14, %v304_v15  ;;  %s608_s4 = sshll.u32 %s1155_s23, 3  ;;  %s766_s9 = scalar_lea.vmem %s1096_s28, 128 }
  0x6c   : > { %s293_s19 = scalar_lea.vmem %s1137_s2, %s608_s4  ;;  %p767_p5 = scmp.ne.s32.totalorder %s1096_s28, %s766_s9 }
  0x6d   : > { %351 = vmax.xlane.f32.xlu1 %v350_v10  ;;  %p1144_p8 = scmp.ne.s32.totalorder %s1142_s24, 0  ;;  %s843_s27 = smov [#allocation7]  }
  0x6e   : > { %315 = vmax.xlane.f32.xlu0 %v314_v11  ;;  %s770_s29 = sshll.u32 %s843_s27, 4  ;;  %s771_s29 = int_to_ptr.vmem [resolvable:$false] %s770_s29 }
  0x6f   : > { %p768_p11 = pnand %p767_p5, %p1144_p8  ;;  %s772_s16 = scalar_lea.vmem %s771_s29, 256 }
  0x70   : > { %p773_p0 = scmp.lt.s32.totalorder %s1096_s28, %s771_s29  ;;  %p774_p1 = scmp.lt.s32.totalorder %s772_s16, %s766_s9 }
  0x71   : > { %354 = vmax.xlane.f32.xlu1 %v353_v16  ;;  %p769_p12 = pneg %p768_p11 }
  0x72   : > { %318 = vmax.xlane.f32.xlu0 %v317_v17  ;;  %p775_p3 = por %p774_p1, %p773_p0 }
  0x74   : > { %p776_p9 = pnand %p775_p3, %p769_p12 }
  0xf2   : > { %v349_v18 = vpop.xlane.xlu1 %348 }
  0xf3   : > { %v1023_v19 = vsub.f32 %v305_v0, %v349_v18  ;;  %v1025_v20 = vsub.f32 %v306_v1, %v349_v18  ;;  %v313_v21 = vpop.xlane.xlu0 %312 }
  0xf4   : > { %v1027_v22 = vsub.f32 %v299_v2, %v313_v21  ;;  %v1029_v23 = vsub.f32 %v300_v4, %v313_v21 }
  0xf5   : > { %v362_v24 = vmul.f32 1.442695, %v1023_v19  ;;  %v364_v25 = vmul.f32 1.442695, %v1025_v20 }
  0xf6   : > { %v326_v26 = vmul.f32 1.442695, %v1027_v22  ;;  %v328_v27 = vmul.f32 1.442695, %v1029_v23  ;;  %v383_v28 = vsub.f32 %v1027_v22, %v1023_v19  ;;  %v384_v29 = vsub.f32 %v1029_v23, %v1025_v20  ;;  %v352_v30 = vpop.xlane.xlu1 %351 }
  0xf7   : > { %672 = vpow2.f32 %v362_v24  ;;  %v1039_v31 = vsub.f32 %v307_v5, %v352_v30  ;;  %v1041_v32 = vsub.f32 %v308_v6, %v352_v30  ;;  %v316_v33 = vpop.xlane.xlu0 %315 }
  0xf8   : > { %674 = vpow2.f32 %v364_v25  ;;  %v1043_v34 = vsub.f32 %v301_v8, %v316_v33  ;;  %v1045_v35 = vsub.f32 %v302_v9, %v316_v33 }
  0xf9   : > { %676 = vpow2.f32 %v326_v26  ;;  %v366_v36 = vmul.f32 1.442695, %v1039_v31  ;;  %v368_v37 = vmul.f32 1.442695, %v1041_v32 }
  0xfa   : > { %678 = vpow2.f32 %v328_v27  ;;  %v330_v38 = vmul.f32 1.442695, %v1043_v34  ;;  %v332_v39 = vmul.f32 1.442695, %v1045_v35  ;;  %v385_v40 = vsub.f32 %v1043_v34, %v1039_v31  ;;  %v355_v41 = vpop.xlane.xlu1 %354 }
  0xfb   : > { %680 = vpow2.f32 %v366_v36  ;;  %v386_v42 = vsub.f32 %v1045_v35, %v1041_v32  ;;  %v1055_v43 = vsub.f32 %v309_v12, %v355_v41  ;;  %v1057_v44 = vsub.f32 %v310_v13, %v355_v41  ;;  %v319_v45 = vpop.xlane.xlu0 %318 }
  0xfc   : > { %682 = vpow2.f32 %v368_v37  ;;  %v1059_v46 = vsub.f32 %v303_v14, %v319_v45  ;;  %v1061_v47 = vsub.f32 %v304_v15, %v319_v45  ;;  %v842_v35 = vmov 0  }
  0xfd   : > { %684 = vpow2.f32 %v330_v38  ;;  %v370_v48 = vmul.f32 1.442695, %v1055_v43  ;;  %v372_v49 = vmul.f32 1.442695, %v1057_v44  ;;  %670 = vset.pattern.permute.xlu1 %v842_v35  ;;  %671 = vset.pattern.permute.xlu0 %v842_v35 }
  0xfe   : > { %686 = vpow2.f32 %v332_v39  ;;  %v334_v50 = vmul.f32 1.442695, %v1059_v46  ;;  %v336_v51 = vmul.f32 1.442695, %v1061_v47  ;;  %v387_v52 = vsub.f32 %v1059_v46, %v1055_v43 }
  0xff   : > { %688 = vpow2.f32 %v370_v48  ;;  %v388_v53 = vsub.f32 %v1061_v47, %v1057_v44  ;;  %v436_v43 = vstv %s435_s5 }
 0x100   : > { %690 = vpow2.f32 %v372_v49 }
 0x101   : > { %692 = vpow2.f32 %v334_v50 }
 0x102   : > { %694 = vpow2.f32 %v336_v51  ;;  %v443_v51 = vld [vmem:[%s293_s19] sm:$0xff] }
 0x104   : > { %v673_v54 = vpop.eup %672 }
 0x105   : > { %v675_v55 = vpop.eup %674 }
 0x106   : > { %v677_v56 = vpop.eup %676  ;;  %v374_v62 = vadd.f32 %v675_v55, %v673_v54 }
 0x107   : > { %v679_v57 = vpop.eup %678 }
 0x108   : > { %v681_v58 = vpop.eup %680  ;;  %v338_v59 = vadd.f32 %v679_v57, %v677_v56 }
 0x109   : > { %v683_v60 = vpop.eup %682 }
 0x10a   : > { %v685_v61 = vpop.eup %684  ;;  %339 = vadd.xlane.f32.xlu0 %v338_v59  ;;  %v377_v4 = vadd.f32 %v683_v60, %v681_v58  ;;  %v444_v58 = vld [vmem:[%s293_s19 + $0x8] sm:$0xff] }
 0x10b   : > { %v687_v63 = vpop.eup %686 }
 0x10c   : > { %v689_v0 = vpop.eup %688  ;;  %v341_v1 = vadd.f32 %v687_v63, %v685_v61 }
 0x10d   : > { %v691_v2 = vpop.eup %690 }
 0x10e   : > { %v693_v3 = vpop.eup %692  ;;  %375 = vadd.xlane.f32.xlu0 %v374_v62  ;;  %342 = vadd.xlane.f32.xlu1 %v341_v1  ;;  %v380_v7 = vadd.f32 %v691_v2, %v689_v0  ;;  %v445_v1 = vld [vmem:[%s293_s19 + $0x10] sm:$0xff] }
 0x10f   : > { %v695_v5 = vpop.eup %694 }
 0x110   : > { %v344_v6 = vadd.f32 %v695_v5, %v693_v3 }
 0x112   : > { %378 = vadd.xlane.f32.xlu1 %v377_v4  ;;  %345 = vadd.xlane.f32.xlu0 %v344_v6 }
 0x116   : > { %381 = vadd.xlane.f32.xlu1 %v380_v7 }
 0x193   : > { %v340_v8 = vpop.xlane.xlu0 %339 }
 0x194   : > { %696 = vlog2.f32 %v340_v8 }
 0x197   : > { %v343_v9 = vpop.xlane.xlu1 %342  ;;  %v376_v10 = vpop.xlane.xlu0 %375 }
 0x198   : > { %698 = vlog2.f32 %v343_v9 }
 0x199   : > { %700 = vlog2.f32 %v376_v10 }
 0x19b   : > { %v379_v11 = vpop.xlane.xlu1 %378  ;;  %v346_v12 = vpop.xlane.xlu0 %345 }
 0x19c   : > { %702 = vlog2.f32 %v379_v11 }
 0x19d   : > { %704 = vlog2.f32 %v346_v12 }
 0x19f   : > { %v382_v13 = vpop.xlane.xlu1 %381 }
 0x1a0   : > { %706 = vlog2.f32 %v382_v13 }
 0x1a1   : > { %v697_v14 = vpop.eup %696  ;;  %708 = vrcp.f32 %v340_v8 }
 0x1a2   : > { %v396_v17 = vmul.f32 0.6931472, %v697_v14  ;;  %710 = vrcp.f32 %v343_v9 }
 0x1a3   : > { %712 = vrcp.f32 %v346_v12 }
 0x1a5   : > { %v699_v15 = vpop.eup %698 }
 0x1a6   : > { %v701_v16 = vpop.eup %700  ;;  %v398_v25 = vmul.f32 0.6931472, %v699_v15 }
 0x1a7   : > { %v390_v18 = vmul.f32 0.6931472, %v701_v16 }
 0x1a9   : > { %v703_v21 = vpop.eup %702  ;;  %v401_v26 = vsub.f32 %v390_v18, %v396_v17 }
 0x1aa   : > { %v705_v24 = vpop.eup %704  ;;  %v392_v27 = vmul.f32 0.6931472, %v703_v21 }
 0x1ab   : > { %v400_v33 = vmul.f32 0.6931472, %v705_v24  ;;  %v404_v36 = vadd.f32 %v401_v26, %v383_v28  ;;  %v405_v37 = vadd.f32 %v401_v26, %v384_v29 }
 0x1ac   : > { %v402_v30 = vsub.f32 %v392_v27, %v398_v25 }
 0x1ad   : > { %v707_v38 = vpop.eup %706  ;;  %v410_v41 = vmul.f32 %v677_v56, %v404_v36  ;;  %v411_v45 = vmul.f32 %v679_v57, %v405_v37 }
 0x1ae   : > { %v394_v39 = vmul.f32 0.6931472, %v707_v38  ;;  %v406_v48 = vadd.f32 %v402_v30, %v385_v40  ;;  %v407_v49 = vadd.f32 %v402_v30, %v386_v42  ;;  %v431_v40 = vlaneseq  ;;  %v709_v47 = vpop.eup %708 }
 0x1af   : > { %v416_v19 = vadd.f32 %v411_v45, %v410_v41  ;;  %v711_v56 = vpop.eup %710 }
 0x1b0   : > { %v403_v50 = vsub.f32 %v394_v39, %v400_v33  ;;  %v412_v22 = vmul.f32 %v685_v61, %v406_v48  ;;  %v413_v28 = vmul.f32 %v687_v63, %v407_v49  ;;  %v432_v42 = vshrl.u32 %v431_v40, 7  ;;  %v713_v62 = vpop.eup %712 }
 0x1b1   : > { %417 = vadd.xlane.f32.xlu0 %v416_v19 }
 0x1b2   : > { %v408_v20 = vadd.f32 %v403_v50, %v387_v52  ;;  %v409_v23 = vadd.f32 %v403_v50, %v388_v53  ;;  %v419_v29 = vadd.f32 %v413_v28, %v412_v22  ;;  %v433_v44 = vadd.s32 8, %v432_v42 }
 0x1b3   : > { %v437_v46 = vadd.s32 %v436_v43, %v432_v42  ;;  %v434_v53 = vadd.s32 16, %v432_v42 }
 0x1b4   : > { %v414_v31 = vmul.f32 %v693_v3, %v408_v20  ;;  %v415_v34 = vmul.f32 %v695_v5, %v409_v23  ;;  %420 = vadd.xlane.f32.xlu1 %v419_v29  ;;  %v438_v55 = vadd.s32 %v436_v43, %v433_v44 }
 0x1b5   : > { %vm440_vm0 = vcmp.lt.s32.totalorder %v437_v46, 136  ;;  %v439_v61 = vadd.s32 %v436_v43, %v434_v53 }
 0x1b6   : > { %v422_v32 = vadd.f32 %v415_v34, %v414_v31  ;;  %vm441_vm1 = vcmp.lt.s32.totalorder %v438_v55, 136 }
 0x1b7   : > { %vm442_vm3 = vcmp.lt.s32.totalorder %v439_v61, 136 }
 0x1b8   : > { %423 = vadd.xlane.f32.xlu0 %v422_v32 }
 0x23a   : > { %v418_v52 = vpop.xlane.xlu0 %417 }
 0x23b   : > { %v428_v54 = vmul.f32 %v709_v47, %v418_v52 }
 0x23d   : > { %v446_v57 = vmul.f32 %v443_v51, %v428_v54  ;;  %v421_v59 = vpop.xlane.xlu1 %420 }
 0x23e   : > { %v429_v60 = vmul.f32 %v711_v56, %v421_v59 }
 0x23f   : > { %v449_v63 = vsel %vm440_vm0, %v446_v57, 0.0 }
 0x240   : > { %v447_v0 = vmul.f32 %v444_v58, %v429_v60  ;;  %v453_v5 = vsel %vm452_vm2, %v449_v63, 0.0 }
 0x241   : > { %v424_v2 = vpop.xlane.xlu0 %423 }
 0x242   : > { %v430_v3 = vmul.f32 %v713_v62, %v424_v2  ;;  %v450_v4 = vsel %vm441_vm1, %v447_v0, 0.0 }
 0x243   : > { %v454_v6 = vsel %vm452_vm2, %v450_v4, 0.0 }
 0x244   : > { %v448_v7 = vmul.f32 %v445_v1, %v430_v3  ;;  %v455_v8 = vadd.f32 %v454_v6, %v453_v5 }
 0x246   : > { %v451_v9 = vsel %vm442_vm3, %v448_v7, 0.0 }
 0x247   : > { %v456_v10 = vsel %vm452_vm2, %v451_v9, 0.0 }
 0x248   : > { %v457_v11 = vadd.f32 %v456_v10, %v455_v8 }
 0x24a   : > { %v458_v12 = vrot.slane %v457_v11, 4 }
 0x24c   : > { %v459_v13 = vadd.f32 %v458_v12, %v457_v11 }
 0x24e   : > { %v460_v14 = vrot.slane %v459_v13, 2 }
 0x250   : > { %v461_v15 = vadd.f32 %v460_v14, %v459_v13 }
 0x252   : > { %v462_v16 = vrot.slane %v461_v15, 1 }
 0x254   : > { %v463_v17 = vadd.f32 %v462_v16, %v461_v15 }
 0x256   : > { %466 = vperm.xlu1 %670, %v463_v17  }
 0x2d1   : > { %v467_v18 = vpop.permute.xlu1 %466 }
 0x2d2   : > { %469 = vst [vmem:[%s272_s26] sm:$0xff] %v467_v18 }
 0x2d3   : > { %779 = shalt.err (!%p776_p9)
}
 0x2d4   : > { %s780_s23 = scalar_lea.hbm %s482_s6, 128  ;;  %s784_s4 = scalar_lea.hbm %s1138_s3, 768 }
 0x2d5   : > { %p781_p10 = scmp.ne.s32.totalorder %s482_s6, %s780_s23  ;;  %p785_p4 = scmp.lt.s32.totalorder %s482_s6, %s1138_s3 }
 0x2d6   : > { %p786_p7 = scmp.lt.s32.totalorder %s784_s4, %s780_s23 }
 0x2d7   : > { %p782_p13 = pnand %p781_p10, %p1144_p8 }
 0x2d8   : > { %p787_p6 = por %p786_p7, %p785_p4 }
 0x2d9   : > { %p783_p2 = pneg %p782_p13 }
 0x2db   : > { %p788_p5 = pnand %p787_p6, %p783_p2 }
 0x2dd   : > { %791 = shalt.err (!%p788_p5)
}
 0x2de   : > { %626 = dma.vmem_to_hbm [thread:$0]  (%p1144_p8), %s1096_s28, 128, %s482_s6, %s471_s7  }
 0x2df PF: > { %p632_p11 = scmp.ge.s32.totalorder %s834_s15, 2  ;;  %s496_s19 = sand.u32 1, %s822_s12  }
 0x2e0   : > { %p1145_p12 = scmp.ne.s32.totalorder %s1143_s25, 0  ;;  %s497_s20 = scalar_lea.sflag [#allocation4], %s496_s19 }
 0x2e2   : > { %p629_p0 = pnand %p632_p11, %p1145_p12 }
 0x2e4   : > { %p630_p1 = pneg %p629_p0 }
 0x2e6   : > { %817 = dma.done.wait (%p630_p1), %s497_s20, 128  }
 0x2e7   : > { %819 = vsyncadd (%p630_p1), %s497_s20, 4294967168  ;;  %p19_p3 = scmp.ge.s32.totalorder %s889_s18, 8   ;;  %s1146_s12 = smov %s826_s13 }
 0x2e8   : > { %s1147_s13 = smov %s830_s14  ;;  %s1148_s14 = smov %s901_s21 }
 0x2e9   : > { %s1149_s15 = smov %s889_s18  ;;  %21 = sbr.rel (!%p19_p3) target bundleno = 7 (0x7), region = 93 }
 0x2ee   :  { %502 = vsyncpa [#allocation3], 1 }
 0x2ef   :  { %504 = vsyncpa [#allocation3 + $0x1], 1 }
 0x2f0   :  { %505 = vsyncpa [#allocation6], 1 }
 0x2f1   :  { %507 = vsyncpa [#allocation6 + $0x1], 1 }
 0x2f2   :  { %508 = vsyncpa [#allocation4], 1 }
 0x2f3   :  { %510 = vsyncpa [#allocation4 + $0x1], 1 }

</bundles_post_ra>
